<compile_context>
chip_gen: v7x
topology: tpu7x:2x2x1
jax: 0.10.0
libtpu: 0.0.40
codegen_flags: <defaults>
</compile_context>

<pallas_src>
import functools

import jax
import jax.numpy as jnp
from jax.experimental import pallas as pl
from jax.experimental.pallas import tpu as pltpu

NUM_CLASSES = 5
CPAD = 8            # class rows padded to a full f32 sublane tile
LANES = 128         # packed-output lane width (one full vreg row)
NCORES = 2          # leading "parallel" grid axis (v7x: 2 TCs; 1-TC chips run it sequentially)
MAX_TILE_N = 2048   # particles per tile on the lane axis (multiple of 128)

# Slots in the single lane-dense (., 128) output vector.
SLOT_LOSS = 0
SLOT_VALID = 1
SLOT_CORRECT = 2
SLOT_CLS_CNT = 8     # .. SLOT_CLS_CNT + num_classes
SLOT_CLS_COR = 16    # .. SLOT_CLS_COR + num_classes


def _particle_type_stats_kernel(logits_ref, labels_ref, out_ref, acc_ref, *,
                                num_classes):
    t = pl.program_id(1)
    nt = pl.num_programs(1)

    labels = labels_ref[...]                        # (1, TN) int32
    valid = labels >= 0                             # (1, TN) bool

    x = logits_ref[...].astype(jnp.float32)         # (CPAD, TN); rows >= num_classes are padding
    rows = [x[k:k + 1, :] for k in range(num_classes)]   # each (1, TN)

    # Running max + first-occurrence argmax over the (unrolled) class axis.
    row_max = rows[0]
    pred = jnp.zeros_like(labels)
    for k in range(1, num_classes):
        gt = rows[k] > row_max
        row_max = jnp.where(gt, rows[k], row_max)
        pred = jnp.where(gt, k, pred)

    # log-sum-exp and logit of the true class (ignore_index = -1 via `valid`).
    sum_exp = jnp.zeros_like(row_max)
    label_logit = jnp.zeros_like(row_max)
    for k in range(num_classes):
        sum_exp = sum_exp + jnp.exp(rows[k] - row_max)
        label_logit = label_logit + jnp.where(labels == k, rows[k], 0.0)
    lse = jnp.log(sum_exp) + row_max

    loss_i = jnp.where(valid, lse - label_logit, 0.0)            # (1, TN)
    validf = valid.astype(jnp.float32)
    correctf = jnp.logical_and(pred == labels, valid).astype(jnp.float32)

    # Pack all partial sums into one lane-dense (CPAD, 128) contribution
    # (values replicated over sublanes; the wrapper reads sublane 0).
    lane = jax.lax.broadcasted_iota(jnp.int32, (CPAD, LANES), 1)
    contrib = jnp.where(lane == SLOT_LOSS, jnp.sum(loss_i), 0.0)
    contrib = jnp.where(lane == SLOT_VALID, jnp.sum(validf), contrib)
    contrib = jnp.where(lane == SLOT_CORRECT, jnp.sum(correctf), contrib)
    for k in range(num_classes):
        is_k = (labels == k).astype(jnp.float32)
        contrib = jnp.where(lane == SLOT_CLS_CNT + k, jnp.sum(is_k), contrib)
        contrib = jnp.where(lane == SLOT_CLS_COR + k,
                            jnp.sum(is_k * correctf), contrib)

    @pl.when(t == 0)
    def _init():
        acc_ref[...] = jnp.zeros_like(acc_ref)

    acc_ref[...] += contrib

    @pl.when(t == nt - 1)
    def _writeback():
        out_ref[...] = acc_ref[...]


def _round_up(x, m):
    return ((x + m - 1) // m) * m


def _run_stats_kernel(logits, labels, num_classes):
    n, c = logits.shape
    assert c == num_classes

    # Lane-dense per-core tile size (multiple of 128, <= MAX_TILE_N).
    tile_n = min(MAX_TILE_N, _round_up(max(pl.cdiv(n, NCORES), 1), LANES))
    tiles_per_core = pl.cdiv(n, NCORES * tile_n)
    n_pad = NCORES * tiles_per_core * tile_n

    # Re-layout: classes on sublanes (padded to CPAD), particles on lanes.
    # Keep the model's native dtype (bf16 stays bf16); upcast happens in-kernel.
    logits_t = jnp.zeros((CPAD, n_pad), dtype=logits.dtype)
    logits_t = logits_t.at[:c, :n].set(logits.T)
    labels_t = jnp.full((1, n_pad), -1, dtype=jnp.int32)       # padding rows ignored
    labels_t = labels_t.at[0, :n].set(labels.astype(jnp.int32))

    itemsize = jnp.dtype(logits.dtype).itemsize
    cost = pl.CostEstimate(
        flops=int(n_pad) * num_classes * 12,
        transcendentals=int(n_pad) * (num_classes + 1),
        bytes_accessed=int(n_pad) * (CPAD * itemsize + 4) + NCORES * CPAD * LANES * 4,
    )

    kernel = functools.partial(_particle_type_stats_kernel,
                               num_classes=num_classes)

    out = pl.pallas_call(
        kernel,
        out_shape=jax.ShapeDtypeStruct((NCORES * CPAD, LANES), jnp.float32),
        grid=(NCORES, tiles_per_core),
        in_specs=[
            pl.BlockSpec((CPAD, tile_n),
                         lambda cc, tt: (0, cc * tiles_per_core + tt)),
            pl.BlockSpec((1, tile_n),
                         lambda cc, tt: (0, cc * tiles_per_core + tt)),
        ],
        out_specs=pl.BlockSpec((CPAD, LANES), lambda cc, tt: (cc, 0)),
        scratch_shapes=[pltpu.VMEM((CPAD, LANES), jnp.float32)],
        compiler_params=pltpu.CompilerParams(
            dimension_semantics=("parallel", "arbitrary")),
        cost_estimate=cost,
    )(logits_t, labels_t)

    # Take sublane 0 of each core's packed block and sum the per-core partials.
    return out.reshape(NCORES, CPAD, LANES)[:, 0, :].sum(axis=0)   # (128,)


@functools.partial(jax.jit, static_argnames=("num_classes",))
def _particle_type_metrics(logits, labels, num_classes=NUM_CLASSES):
    stats = _run_stats_kernel(logits, labels, num_classes)
    loss_sum = stats[SLOT_LOSS]
    n_valid = stats[SLOT_VALID]
    n_correct = stats[SLOT_CORRECT]
    # NOTE: if every label is -1 this divides by zero, matching the original
    # torch module / plain-JAX reference behavior.
    res = {
        'loss': loss_sum / n_valid,
        'accuracy': n_correct / n_valid,
    }
    for k in range(num_classes):
        cnt = stats[SLOT_CLS_CNT + k]
        cor = stats[SLOT_CLS_COR + k]
        res[f'accuracy_class_{k}'] = jnp.where(cnt > 0,
                                               cor / jnp.maximum(cnt, 1.0), 1.0)
    return res


def particle_type_loss(out, type_labels, num_classes=NUM_CLASSES):
    """Loss/accuracy metrics on BayesianParticleClassifier's `logits` output.

    All returned values are device scalars (no blocking host transfers)."""
    logits = out['logits'][0]                         # (N, C), native dtype
    labels = type_labels[0][:, -1].astype(jnp.int32)  # (N,), -1 = ignore
    return _particle_type_metrics(logits, labels, num_classes=num_classes)


def _reference(out, type_labels, num_classes=NUM_CLASSES):
    """Plain-JAX reference for verification."""
    logits = out['logits'][0].astype(jnp.float32)
    labels = type_labels[0][:, -1].astype(jnp.int32)
    valid = labels >= 0
    logp = jax.nn.log_softmax(logits, axis=1)
    picked = jnp.take_along_axis(logp, jnp.maximum(labels, 0)[:, None], axis=1)[:, 0]
    loss = jnp.sum(jnp.where(valid, -picked, 0.0)) / jnp.sum(valid)
    pred = jnp.argmax(logits, axis=1)
    acc = jnp.sum((pred == labels) & valid) / jnp.sum(valid)
    res = {'loss': loss, 'accuracy': acc}
    for k in range(num_classes):
        mask = labels == k
        cnt = jnp.sum(mask)
        res[f'accuracy_class_{k}'] = jnp.where(
            cnt > 0, jnp.sum((pred == labels) & mask) / jnp.maximum(cnt, 1), 1.0)
    return res


if __name__ == "__main__":
    key = jax.random.PRNGKey(0)
    k_logits, k_labels = jax.random.split(key)

    N, C = 64, NUM_CLASSES
    logits = jax.random.normal(k_logits, (N, C), dtype=jnp.float32)
    # label tensor: (N, 6) floats whose LAST column carries the class id in
    # [-1, C-1] (-1 rows are ignored, as in nn.CrossEntropyLoss(ignore_index=-1)).
    lab_col = jax.random.randint(k_labels, (N,), -1, C).astype(jnp.float32)
    type_label_tensor = jnp.concatenate(
        [jnp.zeros((N, 5), jnp.float32), lab_col[:, None]], axis=1)

    out = {'logits': [logits]}
    type_labels = [type_label_tensor]

    res = particle_type_loss(out, type_labels)
    for v in res.values():
        jax.block_until_ready(v)

    ref = _reference(out, type_labels)
    assert abs(float(res['loss']) - float(ref['loss'])) < 1e-4, (res['loss'], ref['loss'])
    assert abs(float(res['accuracy']) - float(ref['accuracy'])) < 1e-6
    for k in range(NUM_CLASSES):
        assert abs(float(res[f'accuracy_class_{k}'])
                   - float(ref[f'accuracy_class_{k}'])) < 1e-6

    print("KERNEL_OK")
</pallas_src>

<mosaic_0001>
module attributes {stable_mosaic.version = 11 : i64} {
  func.func @_particle_type_stats_kernel(%arg0: i32, %arg1: i32, %arg2: memref<8x128xf32, #tpu.memory_space<vmem>>, %arg3: memref<1x128xi32, #tpu.memory_space<vmem>>, %arg4: memref<8x128xf32, #tpu.memory_space<vmem>>, %arg5: memref<8x128xf32, #tpu.memory_space<vmem>>) attributes {dimension_semantics = [#tpu.dimension_semantics<parallel>, #tpu.dimension_semantics<arbitrary>], iteration_bounds = array<i64: 2, 1>, scalar_prefetch = 0 : i64, scratch_operands = 1 : i64, tpu.core_type = #tpu.core_type<tc>, window_params = [{transform_indices = @transform_0, window_bounds = array<i64: 8, 128>}, {transform_indices = @transform_1, window_bounds = array<i64: 1, 128>}, {transform_indices = @transform_2, window_bounds = array<i64: 8, 128>}]} {
    %c0 = arith.constant 0 : index
    %c0_0 = arith.constant 0 : index
    %0 = vector.load %arg3[%c0, %c0_0] : memref<1x128xi32, #tpu.memory_space<vmem>>, vector<1x128xi32>
    %c0_i32 = arith.constant 0 : i32
    %1 = vector.broadcast %c0_i32 : i32 to vector<1x128xi32>
    %2 = arith.cmpi sge, %0, %1 : vector<1x128xi32>
    %c0_1 = arith.constant 0 : index
    %c0_2 = arith.constant 0 : index
    %3 = vector.load %arg2[%c0_1, %c0_2] : memref<8x128xf32, #tpu.memory_space<vmem>>, vector<8x128xf32>
    %4 = vector.extract_strided_slice %3 {offsets = [0, 0], sizes = [1, 128], strides = [1, 1]} : vector<8x128xf32> to vector<1x128xf32>
    %5 = vector.extract_strided_slice %3 {offsets = [1, 0], sizes = [1, 128], strides = [1, 1]} : vector<8x128xf32> to vector<1x128xf32>
    %6 = vector.extract_strided_slice %3 {offsets = [2, 0], sizes = [1, 128], strides = [1, 1]} : vector<8x128xf32> to vector<1x128xf32>
    %7 = vector.extract_strided_slice %3 {offsets = [3, 0], sizes = [1, 128], strides = [1, 1]} : vector<8x128xf32> to vector<1x128xf32>
    %8 = vector.extract_strided_slice %3 {offsets = [4, 0], sizes = [1, 128], strides = [1, 1]} : vector<8x128xf32> to vector<1x128xf32>
    %c0_i32_3 = arith.constant 0 : i32
    %9 = vector.broadcast %c0_i32_3 : i32 to vector<1x128xi32>
    %10 = arith.cmpf ogt, %5, %4 : vector<1x128xf32>
    %11 = arith.select %10, %5, %4 : vector<1x128xi1>, vector<1x128xf32>
    %c1_i32 = arith.constant 1 : i32
    %12 = vector.broadcast %c1_i32 : i32 to vector<1x128xi32>
    %13 = arith.select %10, %12, %9 : vector<1x128xi1>, vector<1x128xi32>
    %14 = arith.cmpf ogt, %6, %11 : vector<1x128xf32>
    %15 = arith.select %14, %6, %11 : vector<1x128xi1>, vector<1x128xf32>
    %c2_i32 = arith.constant 2 : i32
    %16 = vector.broadcast %c2_i32 : i32 to vector<1x128xi32>
    %17 = arith.select %14, %16, %13 : vector<1x128xi1>, vector<1x128xi32>
    %18 = arith.cmpf ogt, %7, %15 : vector<1x128xf32>
    %19 = arith.select %18, %7, %15 : vector<1x128xi1>, vector<1x128xf32>
    %c3_i32 = arith.constant 3 : i32
    %20 = vector.broadcast %c3_i32 : i32 to vector<1x128xi32>
    %21 = arith.select %18, %20, %17 : vector<1x128xi1>, vector<1x128xi32>
    %22 = arith.cmpf ogt, %8, %19 : vector<1x128xf32>
    %23 = arith.select %22, %8, %19 : vector<1x128xi1>, vector<1x128xf32>
    %c4_i32 = arith.constant 4 : i32
    %24 = vector.broadcast %c4_i32 : i32 to vector<1x128xi32>
    %25 = arith.select %22, %24, %21 : vector<1x128xi1>, vector<1x128xi32>
    %cst = arith.constant 0.000000e+00 : f32
    %26 = vector.broadcast %cst : f32 to vector<1x128xf32>
    %cst_4 = arith.constant 0.000000e+00 : f32
    %27 = vector.broadcast %cst_4 : f32 to vector<1x128xf32>
    %28 = arith.subf %4, %23 : vector<1x128xf32>
    %29 = math.exp %28 : vector<1x128xf32>
    %30 = arith.addf %26, %29 : vector<1x128xf32>
    %c0_i32_5 = arith.constant 0 : i32
    %31 = vector.broadcast %c0_i32_5 : i32 to vector<1x128xi32>
    %32 = arith.cmpi eq, %0, %31 : vector<1x128xi32>
    %cst_6 = arith.constant 0.000000e+00 : f32
    %33 = vector.broadcast %cst_6 : f32 to vector<1x128xf32>
    %34 = arith.select %32, %4, %33 : vector<1x128xi1>, vector<1x128xf32>
    %35 = arith.addf %27, %34 : vector<1x128xf32>
    %36 = arith.subf %5, %23 : vector<1x128xf32>
    %37 = math.exp %36 : vector<1x128xf32>
    %38 = arith.addf %30, %37 : vector<1x128xf32>
    %c1_i32_7 = arith.constant 1 : i32
    %39 = vector.broadcast %c1_i32_7 : i32 to vector<1x128xi32>
    %40 = arith.cmpi eq, %0, %39 : vector<1x128xi32>
    %cst_8 = arith.constant 0.000000e+00 : f32
    %41 = vector.broadcast %cst_8 : f32 to vector<1x128xf32>
    %42 = arith.select %40, %5, %41 : vector<1x128xi1>, vector<1x128xf32>
    %43 = arith.addf %35, %42 : vector<1x128xf32>
    %44 = arith.subf %6, %23 : vector<1x128xf32>
    %45 = math.exp %44 : vector<1x128xf32>
    %46 = arith.addf %38, %45 : vector<1x128xf32>
    %c2_i32_9 = arith.constant 2 : i32
    %47 = vector.broadcast %c2_i32_9 : i32 to vector<1x128xi32>
    %48 = arith.cmpi eq, %0, %47 : vector<1x128xi32>
    %cst_10 = arith.constant 0.000000e+00 : f32
    %49 = vector.broadcast %cst_10 : f32 to vector<1x128xf32>
    %50 = arith.select %48, %6, %49 : vector<1x128xi1>, vector<1x128xf32>
    %51 = arith.addf %43, %50 : vector<1x128xf32>
    %52 = arith.subf %7, %23 : vector<1x128xf32>
    %53 = math.exp %52 : vector<1x128xf32>
    %54 = arith.addf %46, %53 : vector<1x128xf32>
    %c3_i32_11 = arith.constant 3 : i32
    %55 = vector.broadcast %c3_i32_11 : i32 to vector<1x128xi32>
    %56 = arith.cmpi eq, %0, %55 : vector<1x128xi32>
    %cst_12 = arith.constant 0.000000e+00 : f32
    %57 = vector.broadcast %cst_12 : f32 to vector<1x128xf32>
    %58 = arith.select %56, %7, %57 : vector<1x128xi1>, vector<1x128xf32>
    %59 = arith.addf %51, %58 : vector<1x128xf32>
    %60 = arith.subf %8, %23 : vector<1x128xf32>
    %61 = math.exp %60 : vector<1x128xf32>
    %62 = arith.addf %54, %61 : vector<1x128xf32>
    %c4_i32_13 = arith.constant 4 : i32
    %63 = vector.broadcast %c4_i32_13 : i32 to vector<1x128xi32>
    %64 = arith.cmpi eq, %0, %63 : vector<1x128xi32>
    %cst_14 = arith.constant 0.000000e+00 : f32
    %65 = vector.broadcast %cst_14 : f32 to vector<1x128xf32>
    %66 = arith.select %64, %8, %65 : vector<1x128xi1>, vector<1x128xf32>
    %67 = arith.addf %59, %66 : vector<1x128xf32>
    %68 = math.log %62 : vector<1x128xf32>
    %69 = arith.addf %68, %23 : vector<1x128xf32>
    %70 = arith.subf %69, %67 : vector<1x128xf32>
    %cst_15 = arith.constant 0.000000e+00 : f32
    %71 = vector.broadcast %cst_15 : f32 to vector<1x128xf32>
    %72 = arith.select %2, %70, %71 : vector<1x128xi1>, vector<1x128xf32>
    %73 = arith.extui %2 : vector<1x128xi1> to vector<1x128xi32>
    %74 = arith.sitofp %73 : vector<1x128xi32> to vector<1x128xf32>
    %75 = arith.cmpi eq, %25, %0 : vector<1x128xi32>
    %76 = arith.andi %75, %2 : vector<1x128xi1>
    %77 = arith.extui %76 : vector<1x128xi1> to vector<1x128xi32>
    %78 = arith.sitofp %77 : vector<1x128xi32> to vector<1x128xf32>
    %79 = tpu.iota {dimensions = array<i32: 1>} : vector<8x128xi32>
    %c0_i32_16 = arith.constant 0 : i32
    %80 = vector.broadcast %c0_i32_16 : i32 to vector<8x128xi32>
    %81 = arith.cmpi eq, %79, %80 : vector<8x128xi32>
    %82 = vector.shape_cast %72 : vector<1x128xf32> to vector<1x1x128xf32>
    %cst_17 = arith.constant dense<0.000000e+00> : vector<1xf32>
    %83 = vector.multi_reduction <add>, %82, %cst_17 [1, 2] : vector<1x1x128xf32> to vector<1xf32>
    %84 = vector.shape_cast %83 : vector<1xf32> to vector<1x1x1xf32>
    %85 = vector.extract %84[0, 0, 0] : f32 from vector<1x1x1xf32>
    %cst_18 = arith.constant 0.000000e+00 : f32
    %86 = vector.broadcast %85 : f32 to vector<8x128xf32>
    %87 = vector.broadcast %cst_18 : f32 to vector<8x128xf32>
    %88 = arith.select %81, %86, %87 : vector<8x128xi1>, vector<8x128xf32>
    %c1_i32_19 = arith.constant 1 : i32
    %89 = vector.broadcast %c1_i32_19 : i32 to vector<8x128xi32>
    %90 = arith.cmpi eq, %79, %89 : vector<8x128xi32>
    %91 = vector.shape_cast %74 : vector<1x128xf32> to vector<1x1x128xf32>
    %cst_20 = arith.constant dense<0.000000e+00> : vector<1xf32>
    %92 = vector.multi_reduction <add>, %91, %cst_20 [1, 2] : vector<1x1x128xf32> to vector<1xf32>
    %93 = vector.shape_cast %92 : vector<1xf32> to vector<1x1x1xf32>
    %94 = vector.extract %93[0, 0, 0] : f32 from vector<1x1x1xf32>
    %95 = vector.broadcast %94 : f32 to vector<8x128xf32>
    %96 = arith.select %90, %95, %88 : vector<8x128xi1>, vector<8x128xf32>
    %c2_i32_21 = arith.constant 2 : i32
    %97 = vector.broadcast %c2_i32_21 : i32 to vector<8x128xi32>
    %98 = arith.cmpi eq, %79, %97 : vector<8x128xi32>
    %99 = vector.shape_cast %78 : vector<1x128xf32> to vector<1x1x128xf32>
    %cst_22 = arith.constant dense<0.000000e+00> : vector<1xf32>
    %100 = vector.multi_reduction <add>, %99, %cst_22 [1, 2] : vector<1x1x128xf32> to vector<1xf32>
    %101 = vector.shape_cast %100 : vector<1xf32> to vector<1x1x1xf32>
    %102 = vector.extract %101[0, 0, 0] : f32 from vector<1x1x1xf32>
    %103 = vector.broadcast %102 : f32 to vector<8x128xf32>
    %104 = arith.select %98, %103, %96 : vector<8x128xi1>, vector<8x128xf32>
    %c0_i32_23 = arith.constant 0 : i32
    %105 = vector.broadcast %c0_i32_23 : i32 to vector<1x128xi32>
    %106 = arith.cmpi eq, %0, %105 : vector<1x128xi32>
    %107 = arith.extui %106 : vector<1x128xi1> to vector<1x128xi32>
    %108 = arith.sitofp %107 : vector<1x128xi32> to vector<1x128xf32>
    %c8_i32 = arith.constant 8 : i32
    %109 = vector.broadcast %c8_i32 : i32 to vector<8x128xi32>
    %110 = arith.cmpi eq, %79, %109 : vector<8x128xi32>
    %111 = vector.shape_cast %108 : vector<1x128xf32> to vector<1x1x128xf32>
    %cst_24 = arith.constant dense<0.000000e+00> : vector<1xf32>
    %112 = vector.multi_reduction <add>, %111, %cst_24 [1, 2] : vector<1x1x128xf32> to vector<1xf32>
    %113 = vector.shape_cast %112 : vector<1xf32> to vector<1x1x1xf32>
    %114 = vector.extract %113[0, 0, 0] : f32 from vector<1x1x1xf32>
    %115 = vector.broadcast %114 : f32 to vector<8x128xf32>
    %116 = arith.select %110, %115, %104 : vector<8x128xi1>, vector<8x128xf32>
    %c16_i32 = arith.constant 16 : i32
    %117 = vector.broadcast %c16_i32 : i32 to vector<8x128xi32>
    %118 = arith.cmpi eq, %79, %117 : vector<8x128xi32>
    %119 = arith.mulf %108, %78 : vector<1x128xf32>
    %120 = vector.shape_cast %119 : vector<1x128xf32> to vector<1x1x128xf32>
    %cst_25 = arith.constant dense<0.000000e+00> : vector<1xf32>
    %121 = vector.multi_reduction <add>, %120, %cst_25 [1, 2] : vector<1x1x128xf32> to vector<1xf32>
    %122 = vector.shape_cast %121 : vector<1xf32> to vector<1x1x1xf32>
    %123 = vector.extract %122[0, 0, 0] : f32 from vector<1x1x1xf32>
    %124 = vector.broadcast %123 : f32 to vector<8x128xf32>
    %125 = arith.select %118, %124, %116 : vector<8x128xi1>, vector<8x128xf32>
    %c1_i32_26 = arith.constant 1 : i32
    %126 = vector.broadcast %c1_i32_26 : i32 to vector<1x128xi32>
    %127 = arith.cmpi eq, %0, %126 : vector<1x128xi32>
    %128 = arith.extui %127 : vector<1x128xi1> to vector<1x128xi32>
    %129 = arith.sitofp %128 : vector<1x128xi32> to vector<1x128xf32>
    %c9_i32 = arith.constant 9 : i32
    %130 = vector.broadcast %c9_i32 : i32 to vector<8x128xi32>
    %131 = arith.cmpi eq, %79, %130 : vector<8x128xi32>
    %132 = vector.shape_cast %129 : vector<1x128xf32> to vector<1x1x128xf32>
    %cst_27 = arith.constant dense<0.000000e+00> : vector<1xf32>
    %133 = vector.multi_reduction <add>, %132, %cst_27 [1, 2] : vector<1x1x128xf32> to vector<1xf32>
    %134 = vector.shape_cast %133 : vector<1xf32> to vector<1x1x1xf32>
    %135 = vector.extract %134[0, 0, 0] : f32 from vector<1x1x1xf32>
    %136 = vector.broadcast %135 : f32 to vector<8x128xf32>
    %137 = arith.select %131, %136, %125 : vector<8x128xi1>, vector<8x128xf32>
    %c17_i32 = arith.constant 17 : i32
    %138 = vector.broadcast %c17_i32 : i32 to vector<8x128xi32>
    %139 = arith.cmpi eq, %79, %138 : vector<8x128xi32>
    %140 = arith.mulf %129, %78 : vector<1x128xf32>
    %141 = vector.shape_cast %140 : vector<1x128xf32> to vector<1x1x128xf32>
    %cst_28 = arith.constant dense<0.000000e+00> : vector<1xf32>
    %142 = vector.multi_reduction <add>, %141, %cst_28 [1, 2] : vector<1x1x128xf32> to vector<1xf32>
    %143 = vector.shape_cast %142 : vector<1xf32> to vector<1x1x1xf32>
    %144 = vector.extract %143[0, 0, 0] : f32 from vector<1x1x1xf32>
    %145 = vector.broadcast %144 : f32 to vector<8x128xf32>
    %146 = arith.select %139, %145, %137 : vector<8x128xi1>, vector<8x128xf32>
    %c2_i32_29 = arith.constant 2 : i32
    %147 = vector.broadcast %c2_i32_29 : i32 to vector<1x128xi32>
    %148 = arith.cmpi eq, %0, %147 : vector<1x128xi32>
    %149 = arith.extui %148 : vector<1x128xi1> to vector<1x128xi32>
    %150 = arith.sitofp %149 : vector<1x128xi32> to vector<1x128xf32>
    %c10_i32 = arith.constant 10 : i32
    %151 = vector.broadcast %c10_i32 : i32 to vector<8x128xi32>
    %152 = arith.cmpi eq, %79, %151 : vector<8x128xi32>
    %153 = vector.shape_cast %150 : vector<1x128xf32> to vector<1x1x128xf32>
    %cst_30 = arith.constant dense<0.000000e+00> : vector<1xf32>
    %154 = vector.multi_reduction <add>, %153, %cst_30 [1, 2] : vector<1x1x128xf32> to vector<1xf32>
    %155 = vector.shape_cast %154 : vector<1xf32> to vector<1x1x1xf32>
    %156 = vector.extract %155[0, 0, 0] : f32 from vector<1x1x1xf32>
    %157 = vector.broadcast %156 : f32 to vector<8x128xf32>
    %158 = arith.select %152, %157, %146 : vector<8x128xi1>, vector<8x128xf32>
    %c18_i32 = arith.constant 18 : i32
    %159 = vector.broadcast %c18_i32 : i32 to vector<8x128xi32>
    %160 = arith.cmpi eq, %79, %159 : vector<8x128xi32>
    %161 = arith.mulf %150, %78 : vector<1x128xf32>
    %162 = vector.shape_cast %161 : vector<1x128xf32> to vector<1x1x128xf32>
    %cst_31 = arith.constant dense<0.000000e+00> : vector<1xf32>
    %163 = vector.multi_reduction <add>, %162, %cst_31 [1, 2] : vector<1x1x128xf32> to vector<1xf32>
    %164 = vector.shape_cast %163 : vector<1xf32> to vector<1x1x1xf32>
    %165 = vector.extract %164[0, 0, 0] : f32 from vector<1x1x1xf32>
    %166 = vector.broadcast %165 : f32 to vector<8x128xf32>
    %167 = arith.select %160, %166, %158 : vector<8x128xi1>, vector<8x128xf32>
    %c3_i32_32 = arith.constant 3 : i32
    %168 = vector.broadcast %c3_i32_32 : i32 to vector<1x128xi32>
    %169 = arith.cmpi eq, %0, %168 : vector<1x128xi32>
    %170 = arith.extui %169 : vector<1x128xi1> to vector<1x128xi32>
    %171 = arith.sitofp %170 : vector<1x128xi32> to vector<1x128xf32>
    %c11_i32 = arith.constant 11 : i32
    %172 = vector.broadcast %c11_i32 : i32 to vector<8x128xi32>
    %173 = arith.cmpi eq, %79, %172 : vector<8x128xi32>
    %174 = vector.shape_cast %171 : vector<1x128xf32> to vector<1x1x128xf32>
    %cst_33 = arith.constant dense<0.000000e+00> : vector<1xf32>
    %175 = vector.multi_reduction <add>, %174, %cst_33 [1, 2] : vector<1x1x128xf32> to vector<1xf32>
    %176 = vector.shape_cast %175 : vector<1xf32> to vector<1x1x1xf32>
    %177 = vector.extract %176[0, 0, 0] : f32 from vector<1x1x1xf32>
    %178 = vector.broadcast %177 : f32 to vector<8x128xf32>
    %179 = arith.select %173, %178, %167 : vector<8x128xi1>, vector<8x128xf32>
    %c19_i32 = arith.constant 19 : i32
    %180 = vector.broadcast %c19_i32 : i32 to vector<8x128xi32>
    %181 = arith.cmpi eq, %79, %180 : vector<8x128xi32>
    %182 = arith.mulf %171, %78 : vector<1x128xf32>
    %183 = vector.shape_cast %182 : vector<1x128xf32> to vector<1x1x128xf32>
    %cst_34 = arith.constant dense<0.000000e+00> : vector<1xf32>
    %184 = vector.multi_reduction <add>, %183, %cst_34 [1, 2] : vector<1x1x128xf32> to vector<1xf32>
    %185 = vector.shape_cast %184 : vector<1xf32> to vector<1x1x1xf32>
    %186 = vector.extract %185[0, 0, 0] : f32 from vector<1x1x1xf32>
    %187 = vector.broadcast %186 : f32 to vector<8x128xf32>
    %188 = arith.select %181, %187, %179 : vector<8x128xi1>, vector<8x128xf32>
    %c4_i32_35 = arith.constant 4 : i32
    %189 = vector.broadcast %c4_i32_35 : i32 to vector<1x128xi32>
    %190 = arith.cmpi eq, %0, %189 : vector<1x128xi32>
    %191 = arith.extui %190 : vector<1x128xi1> to vector<1x128xi32>
    %192 = arith.sitofp %191 : vector<1x128xi32> to vector<1x128xf32>
    %c12_i32 = arith.constant 12 : i32
    %193 = vector.broadcast %c12_i32 : i32 to vector<8x128xi32>
    %194 = arith.cmpi eq, %79, %193 : vector<8x128xi32>
    %195 = vector.shape_cast %192 : vector<1x128xf32> to vector<1x1x128xf32>
    %cst_36 = arith.constant dense<0.000000e+00> : vector<1xf32>
    %196 = vector.multi_reduction <add>, %195, %cst_36 [1, 2] : vector<1x1x128xf32> to vector<1xf32>
    %197 = vector.shape_cast %196 : vector<1xf32> to vector<1x1x1xf32>
    %198 = vector.extract %197[0, 0, 0] : f32 from vector<1x1x1xf32>
    %199 = vector.broadcast %198 : f32 to vector<8x128xf32>
    %200 = arith.select %194, %199, %188 : vector<8x128xi1>, vector<8x128xf32>
    %c20_i32 = arith.constant 20 : i32
    %201 = vector.broadcast %c20_i32 : i32 to vector<8x128xi32>
    %202 = arith.cmpi eq, %79, %201 : vector<8x128xi32>
    %203 = arith.mulf %192, %78 : vector<1x128xf32>
    %204 = vector.shape_cast %203 : vector<1x128xf32> to vector<1x1x128xf32>
    %cst_37 = arith.constant dense<0.000000e+00> : vector<1xf32>
    %205 = vector.multi_reduction <add>, %204, %cst_37 [1, 2] : vector<1x1x128xf32> to vector<1xf32>
    %206 = vector.shape_cast %205 : vector<1xf32> to vector<1x1x1xf32>
    %207 = vector.extract %206[0, 0, 0] : f32 from vector<1x1x1xf32>
    %208 = vector.broadcast %207 : f32 to vector<8x128xf32>
    %209 = arith.select %202, %208, %200 : vector<8x128xi1>, vector<8x128xf32>
    %c0_i32_38 = arith.constant 0 : i32
    %210 = arith.cmpi eq, %arg1, %c0_i32_38 : i32
    %211 = arith.extui %210 : i1 to i32
    %c0_i32_39 = arith.constant 0 : i32
    %212 = arith.cmpi ne, %211, %c0_i32_39 : i32
    scf.if %212 {
      %cst_46 = arith.constant 0.000000e+00 : f32
      %219 = vector.broadcast %cst_46 : f32 to vector<8x128xf32>
      %c0_47 = arith.constant 0 : index
      %c0_48 = arith.constant 0 : index
      %220 = vector.load %arg5[%c0_47, %c0_48] : memref<8x128xf32, #tpu.memory_space<vmem>>, vector<8x128xf32>
      tpu.vector_store %arg5[%c0_47, %c0_48], %219 {strides = array<i32>} : memref<8x128xf32, #tpu.memory_space<vmem>>, vector<8x128xf32>,
    } else {
    }
    %c0_40 = arith.constant 0 : index
    %c0_41 = arith.constant 0 : index
    %213 = vector.load %arg5[%c0_40, %c0_41] : memref<8x128xf32, #tpu.memory_space<vmem>>, vector<8x128xf32>
    %214 = arith.addf %213, %209 : vector<8x128xf32>
    %c0_42 = arith.constant 0 : index
    %c0_43 = arith.constant 0 : index
    %215 = vector.load %arg5[%c0_42, %c0_43] : memref<8x128xf32, #tpu.memory_space<vmem>>, vector<8x128xf32>
    tpu.vector_store %arg5[%c0_42, %c0_43], %214 {strides = array<i32>} : memref<8x128xf32, #tpu.memory_space<vmem>>, vector<8x128xf32>,
    %c0_i32_44 = arith.constant 0 : i32
    %216 = arith.cmpi eq, %arg1, %c0_i32_44 : i32
    %217 = arith.extui %216 : i1 to i32
    %c0_i32_45 = arith.constant 0 : i32
    %218 = arith.cmpi ne, %217, %c0_i32_45 : i32
    scf.if %218 {
      %c0_46 = arith.constant 0 : index
      %c0_47 = arith.constant 0 : index
      %219 = vector.load %arg5[%c0_46, %c0_47] : memref<8x128xf32, #tpu.memory_space<vmem>>, vector<8x128xf32>
      %c0_48 = arith.constant 0 : index
      %c0_49 = arith.constant 0 : index
      %220 = vector.load %arg4[%c0_48, %c0_49] : memref<8x128xf32, #tpu.memory_space<vmem>>, vector<8x128xf32>
      tpu.vector_store %arg4[%c0_48, %c0_49], %219 {strides = array<i32>} : memref<8x128xf32, #tpu.memory_space<vmem>>, vector<8x128xf32>,
    } else {
    }
    return
  }
  func.func @transform_0(%arg0: i32, %arg1: i32) -> (i32, i32) {
    %c1_i32 = arith.constant 1 : i32
    %0 = arith.muli %arg0, %c1_i32 : i32
    %1 = arith.addi %0, %arg1 : i32
    %c0_i32 = arith.constant 0 : i32
    %c0_i32_0 = arith.constant 0 : i32
    return %c0_i32, %1 : i32, i32
  }
  func.func @transform_1(%arg0: i32, %arg1: i32) -> (i32, i32) {
    %c1_i32 = arith.constant 1 : i32
    %0 = arith.muli %arg0, %c1_i32 : i32
    %1 = arith.addi %0, %arg1 : i32
    %c0_i32 = arith.constant 0 : i32
    %c0_i32_0 = arith.constant 0 : i32
    return %c0_i32, %1 : i32, i32
  }
  func.func @transform_2(%arg0: i32, %arg1: i32) -> (i32, i32) {
    %c0_i32 = arith.constant 0 : i32
    %c0_i32_0 = arith.constant 0 : i32
    return %arg0, %c0_i32 : i32, i32
  }
}

</mosaic_0001>

<bundles_post_ra>
// kernel: _particle_type_metrics.1
= control target key start
LH: loop header
LB: loop body
LE: loop exit
PB: predicated region body
PF: predicated region fallthrough
CT: control target
= control target key end

     0   :  { %s741_s9 = smov 0   ;;  %s743_s10 = smov 0   ;;  %s901_s0 = inlined_call_operand.vmem [shape: f32[8,256], index: 0, kind: input, shape index: {}]   ;;  %s902_s1 = inlined_call_operand.vmem [shape: s32[1,256], index: 1, kind: input, shape index: {}]   ;;  %s903_s2 = inlined_call_operand.vmem [shape: f32[16,128], index: 2, kind: output, shape index: {}]  }
   0x1   :  { %s745_s11 = smov 0  }
   0x2 LB: > { %s24_s12 = sadd.s32 1, %s717_s10  ;;  %p621_p0 = scmp.ge.s32.totalorder %s721_s11, 1  ;;  %s721_s11 = sphi %s745_s11, %s12_s11   ;;  %s717_s10 = sphi %s743_s10, %s905_s10   ;;  %s713_s9 = sphi %s741_s9, %s904_s9  }
   0x3   : > { %p26_p1 = scmp.ge.s32.totalorder %s24_s12, 2  ;;  %p139_p2 = scmp.lt.s32.totalorder %s721_s11, 3 }
   0x5   : > { %s907_s12 = smov (%p26_p1, %s24_s12), 0  ;;  %p140_p3 = pnand %p621_p0, %p139_p2 }
   0x6   : > { %p165_p4 = scmp.lt.s32.totalorder (!%p140_p3), %s713_s9, 1  ;;  %v232_v1 = vlaneseq (!%p140_p3)  ;;  %vm331_vm0 = vcmask (!%p140_p3), 1040384   ;;  %v723_v3 = vmov (!%p140_p3), 0.0   ;;  %v724_v12 = vmov (!%p140_p3), 0  }
   0x7   : > { %143 = sbr.rel (%p140_p3) target bundleno = 299 (0x12b), region = 28  ;;  %v725_v23 = vmov (!%p140_p3), 1966171168  }
   0x8   : > { %v233_v9 = vshrl.u32 (!%p140_p3), %v232_v1, 7  ;;  %v230_v24 = vunpack.c.l.s4 (!%p140_p3), %v725_v23 }
   0xa   : > { %v317_v17 = vsub.s32 (!%p140_p3), 0, %v233_v9  ;;  %v231_v31 = vunpack.c.0.s8 (!%p140_p3), %v230_v24 }
   0xc   : > { %v815_v37 = vsub.s32 (!%p140_p3), %v231_v31, %v233_v9 }
   0xe   : > { %s909_s9 = smov (!%p165_p4, %s713_s9), 1 }
   0xf   : > { %s173_s15 = scalar_lea.vmem %s902_s1, %s909_s9  ;;  %s622_s16 = sshll.u32 %s909_s9, 3 }
  0x10   : > { %v766_v0 = vld [vmem:[%s173_s15] sm:$0x1]  ;;  %s168_s19 = scalar_lea.vmem %s901_s0, %s622_s16  ;;  %s178_s6 = scalar_lea.vmem %s903_s2, %s622_s16 }
  0x11   : > { %vm180_vm1 = vcmp.ge.s32.totalorder %v766_v0, 0  ;;  %v774_v2 = vld [vmem:[%s168_s19] sm:$0xff]  ;;  %vm216_vm2 = vcmp.eq.s32.totalorder %v766_v0, 0  ;;  %vm228_vm3 = vcmp.eq.s32.totalorder %v766_v0, 1  ;;  %v318_v28 = vrot.slane %v766_v0, %v317_v17 }
  0x12   : > { %v624_v4 = vsel %vm180_vm1, 1.0, %v723_v3  ;;  %v183_v5 = vrot.slane %v774_v2, 7  ;;  %v785_v6 = vsel %vm216_vm2, 1.0, %v723_v3  ;;  %v795_v10 = vsel %vm228_vm3, 1.0, %v723_v3 }
  0x13   : > { %v345_v7 = vsel %vm331_vm0, %v624_v4, 0.0  ;;  %v376_v8 = vsel %vm331_vm0, %v785_v6, 0.0  ;;  %v421_v14 = vsel %vm331_vm0, %v795_v10, 0.0  ;;  %v313_v20 = vsel %vm180_vm1, 1, %v724_v12 }
  0x14   : > { %346 = vadd.xlane.f32.xlu0 %v345_v7  ;;  %vm185_vm4 = vcmp.gt.f32.partialorder %v774_v2, %v183_v5  ;;  %377 = vadd.xlane.f32.xlu1 %v376_v8  ;;  %v323_v25 = vrot.slane %v313_v20, %v317_v17  ;;  %vm263_vm9 = vcmp.eq.s32.totalorder %v766_v0, 2  ;;  %vm277_vm12 = vcmp.eq.s32.totalorder %v766_v0, 3 }
  0x15   : > { %v186_v11 = vsel %vm185_vm4, %v774_v2, %v183_v5  ;;  %v187_v13 = vsel %vm185_vm4, 1, %v724_v12  ;;  %v820_v38 = vsel %vm263_vm9, 1.0, %v723_v3  ;;  %v629_v57 = vsel %vm277_vm12, 1.0, %v723_v3 }
  0x16   : > { %v189_v15 = vrot.slane %v186_v11, 7  ;;  %v193_v16 = vrot.slane %v187_v13, 7  ;;  %vm324_vm8 = vcmp.ne.s32.totalorder %v323_v25, 0  ;;  %v450_v56 = vsel %vm331_vm0, %v820_v38, 0.0 }
  0x17   : > { %v235_v61 = vrot.slane %v774_v2, %v815_v37  ;;  %vm289_vm13 = vcmp.eq.s32.totalorder %v766_v0, 4  ;;  %v479_v62 = vsel %vm331_vm0, %v629_v57, 0.0  ;;  %v290_v23 = vcombine.high %v774_v2, %v774_v2 }
  0x18   : > { %vm191_vm5 = vcmp.gt.f32.partialorder %v774_v2, %v189_v15  ;;  %422 = vadd.xlane.f32.xlu1 %v421_v14  ;;  %v630_v63 = vsel %vm289_vm13, 1.0, %v723_v3 }
  0x19   : > { %v192_v18 = vsel %vm191_vm5, %v774_v2, %v189_v15  ;;  %v194_v19 = vsel %vm191_vm5, 2, %v193_v16  ;;  %v508_v7 = vsel %vm331_vm0, %v630_v63, 0.0  ;;  %v243_v14 = vrot.slane %v235_v61, %v815_v37 }
  0x1a   : > { %v196_v21 = vrot.slane %v192_v18, 7  ;;  %v200_v22 = vrot.slane %v194_v19, 7  ;;  %v217_v19 = vsel %vm216_vm2, %v774_v2, 0.0 }
  0x1c   : > { %vm198_vm6 = vcmp.gt.f32.partialorder %v774_v2, %v196_v21 }
  0x1d   : > { %v199_v26 = vsel %vm198_vm6, %v774_v2, %v196_v21  ;;  %v201_v27 = vsel %vm198_vm6, 3, %v200_v22  ;;  %v264_v21 = vcombine.high %v243_v14, %v243_v14 }
  0x1e   : > { %v203_v29 = vrot.slane %v199_v26, 7  ;;  %v207_v30 = vrot.slane %v201_v27, 7 }
  0x1f   : > { %v266_v27 = vsel %vm263_vm9, %v264_v21, 0.0 }
  0x20   : > { %vm205_vm7 = vcmp.gt.f32.partialorder %v774_v2, %v203_v29 }
  0x21   : > { %v809_v32 = vsel %vm205_vm7, %v774_v2, %v203_v29  ;;  %v208_v33 = vsel %vm205_vm7, 4, %v207_v30 }
  0x22   : > { %v219_v34 = vrot.slane %v809_v32, 3  ;;  %v254_v35 = vrot.slane %v809_v32, 2  ;;  %v268_v36 = vrot.slane %v809_v32, 1  ;;  %vm319_vm10 = vcmp.eq.s32.totalorder %v208_v33, %v318_v28 }
  0x23   : > { %vm325_vm11 = vmand %vm319_vm10, %vm324_vm8  ;;  %v210_v39 = vrot.slane %v809_v32, 4  ;;  %v282_v40 = vsub.f32 %v774_v2, %v809_v32  ;;  %v297_v28 = vrot.slane %v290_v23, %v815_v37 }
  0x24   : > { %v221_v41 = vsub.f32 %v774_v2, %v219_v34  ;;  %v625_v42 = vsel %vm325_vm11, 1.0, %v723_v3  ;;  %v256_v43 = vsub.f32 %v774_v2, %v254_v35  ;;  %v270_v44 = vsub.f32 %v774_v2, %v268_v36 }
  0x25   : > { %v389_v45 = vcombine.high %v625_v42, %v625_v42  ;;  %v359_v46 = vrot.slane %v625_v42, 4  ;;  %v212_v47 = vsub.f32 %v774_v2, %v210_v39  ;;  %v283_v48 = vmul.f32 1.442695, %v282_v40 }
  0x26   : > { %v222_v49 = vmul.f32 1.442695, %v221_v41  ;;  %v257_v50 = vmul.f32 1.442695, %v256_v43  ;;  %v271_v51 = vmul.f32 1.442695, %v270_v44  ;;  %v304_v31 = vrot.slane %v297_v28, %v815_v37 }
  0x27   : > { %v396_v52 = vrot.slane %v389_v45, %v815_v37  ;;  %v361_v53 = vsel %vm331_vm0, %v359_v46, 0.0  ;;  %v213_v54 = vmul.f32 1.442695, %v212_v47  ;;  %687 = vpow2.f32 %v283_v48 }
  0x28   : > { %362 = vadd.xlane.f32.xlu1 %v361_v53  ;;  %689 = vpow2.f32 %v222_v49  ;;  %v306_v34 = vsel %vm289_vm13, %v304_v31, 0.0 }
  0x29   : > { %v835_v55 = vrot.slane %v396_v52, %v815_v37  ;;  %691 = vpow2.f32 %v213_v54 }
  0x2a   : > { %693 = vpow2.f32 %v257_v50 }
  0x2b   : > { %v405_v58 = vmul.f32 %v785_v6, %v835_v55  ;;  %v434_v59 = vmul.f32 %v795_v10, %v835_v55  ;;  %695 = vpow2.f32 %v271_v51  ;;  %v236_v6 = vcombine.high %v235_v61, %v235_v61 }
  0x2c   : > { %451 = vadd.xlane.f32.xlu1 %v450_v56  ;;  %v463_v42 = vmul.f32 %v820_v38, %v835_v55  ;;  %v492_v45 = vmul.f32 %v629_v57, %v835_v55  ;;  %v521_v32 = vmul.f32 %v630_v63, %v835_v55 }
  0x2d   : > { %v406_v60 = vsel %vm331_vm0, %v405_v58, 0.0  ;;  %v435_v4 = vsel %vm331_vm0, %v434_v59, 0.0  ;;  %v250_v13 = vrot.slane %v236_v6, %v815_v37 }
  0x2e   : > { %407 = vadd.xlane.f32.xlu0 %v406_v60  ;;  %v464_v37 = vsel %vm331_vm0, %v463_v42, 0.0  ;;  %v493_v46 = vsel %vm331_vm0, %v492_v45, 0.0 }
  0x2f   : > { %v252_v20 = vsel %vm228_vm3, %v250_v13, 0.0  ;;  %v278_v26 = vcombine.high %v250_v13, %v250_v13 }
  0x30   : > { %480 = vadd.xlane.f32.xlu1 %v479_v62  ;;  %v253_v25 = vadd.f32 %v252_v20, %v217_v19 }
  0x31   : > { %v688_v5 = vpop.eup %687  ;;  %v280_v30 = vsel %vm277_vm12, %v278_v26, 0.0 }
  0x32   : > { %v690_v8 = vpop.eup %689  ;;  %436 = vadd.xlane.f32.xlu0 %v435_v4  ;;  %v286_v18 = vrot.slane %v688_v5, 4  ;;  %v267_v29 = vadd.f32 %v266_v27, %v253_v25 }
  0x33   : > { %v692_v9 = vpop.eup %691  ;;  %v225_v10 = vrot.slane %v690_v8, 1 }
  0x34   : > { %v694_v11 = vpop.eup %693  ;;  %509 = vadd.xlane.f32.xlu1 %v508_v7  ;;  %v281_v33 = vadd.f32 %v280_v30, %v267_v29 }
  0x35   : > { %v696_v12 = vpop.eup %695  ;;  %v227_v15 = vadd.f32 %v692_v9, %v225_v10  ;;  %v260_v3 = vrot.slane %v694_v11, 2 }
  0x36   : > { %v274_v16 = vrot.slane %v696_v12, 3  ;;  %v307_v35 = vadd.f32 %v306_v34, %v281_v33 }
  0x37   : > { %v262_v17 = vadd.f32 %v260_v3, %v227_v15 }
  0x39   : > { %v276_v22 = vadd.f32 %v274_v16, %v262_v17 }
  0x3b   : > { %v288_v24 = vadd.f32 %v286_v18, %v276_v22 }
  0x3d   : > { %697 = vlog2.f32 %v288_v24 }
  0x47   : > { %v698_v2 = vpop.eup %697 }
  0x48   : > { %v309_v36 = vmul.f32 0.6931472, %v698_v2 }
  0x4a   : > { %v310_v40 = vadd.f32 %v309_v36, %v210_v39  ;;  %v522_v39 = vsel %vm331_vm0, %v521_v32, 0.0 }
  0x4c   : > { %v311_v41 = vsub.f32 %v310_v40, %v307_v35 }
  0x4e   : > { %v312_v43 = vsel %vm180_vm1, %v311_v41, 0.0 }
  0x4f   : > { %v332_v44 = vsel %vm331_vm0, %v312_v43, 0.0 }
  0x50   : > { %333 = vadd.xlane.f32.xlu0 %v332_v44 }
  0x54   : > { %465 = vadd.xlane.f32.xlu0 %v464_v37 }
  0x58   : > { %494 = vadd.xlane.f32.xlu0 %v493_v46 }
  0x5c   : > { %523 = vadd.xlane.f32.xlu0 %v522_v39 }
  0xa1   : > { %v378_v38 = vpop.xlane.xlu1 %377  ;;  %v347_v48 = vpop.xlane.xlu0 %346 }
  0xa2   : > { %v348_v51 = vrot.slane %v347_v48, 4  ;;  %v379_v54 = vrot.slane %v378_v38, 4 }
  0xa4   : > { %v349_v58 = vadd.f32 %v348_v51, %v347_v48  ;;  %v380_v61 = vadd.f32 %v379_v54, %v378_v38 }
  0xa5   : > { %v423_v47 = vpop.xlane.xlu1 %422 }
  0xa6   : > { %v424_v59 = vrot.slane %v423_v47, 4  ;;  %v350_v5 = vrot.slane %v349_v58, 2  ;;  %v381_v12 = vrot.slane %v380_v61, 2 }
  0xa8   : > { %v425_v6 = vadd.f32 %v424_v59, %v423_v47  ;;  %v351_v19 = vadd.f32 %v350_v5, %v349_v58  ;;  %v382_v26 = vadd.f32 %v381_v12, %v380_v61 }
  0xaa   : > { %v426_v16 = vrot.slane %v425_v6, 2  ;;  %v352_v33 = vrot.slane %v351_v19, 1  ;;  %v383_v43 = vrot.slane %v382_v26, 1 }
  0xac   : > { %v427_v2 = vadd.f32 %v426_v16, %v425_v6  ;;  %v353_v38 = vadd.f32 %v352_v33, %v351_v19  ;;  %v384_v54 = vadd.f32 %v383_v43, %v382_v26 }
  0xb5   : > { %v363_v0 = vpop.xlane.xlu1 %362 }
  0xb6   : > { %v364_v52 = vrot.slane %v363_v0, 4 }
  0xb8   : > { %v365_v60 = vadd.f32 %v364_v52, %v363_v0  ;;  %v428_v0 = vrot.slane %v427_v2, 1 }
  0xb9   : > { %v452_v49 = vpop.xlane.xlu1 %451 }
  0xba   : > { %v453_v62 = vrot.slane %v452_v49, 4  ;;  %v366_v7 = vrot.slane %v365_v60, 2 }
  0xbb   : > { %v408_v50 = vpop.xlane.xlu0 %407 }
  0xbc   : > { %v409_v57 = vrot.slane %v408_v50, 4  ;;  %v454_v13 = vadd.f32 %v453_v62, %v452_v49  ;;  %v367_v20 = vadd.f32 %v366_v7, %v365_v60  ;;  %v429_v60 = vadd.f32 %v428_v0, %v427_v2 }
  0xbd   : > { %v481_v53 = vpop.xlane.xlu1 %480 }
  0xbe   : > { %v410_v63 = vadd.f32 %v409_v57, %v408_v50  ;;  %v482_v9 = vrot.slane %v481_v53, 4  ;;  %v455_v24 = vrot.slane %v454_v13, 2  ;;  %v368_v34 = vrot.slane %v367_v20, 1 }
  0xbf   : > { %v437_v56 = vpop.xlane.xlu0 %436 }
  0xc0   : > { %v438_v55 = vrot.slane %v437_v56, 4  ;;  %v411_v15 = vrot.slane %v410_v63, 2  ;;  %v483_v17 = vadd.f32 %v482_v9, %v481_v53  ;;  %v456_v44 = vadd.f32 %v455_v24, %v454_v13 }
  0xc1   : > { %v510_v4 = vpop.xlane.xlu1 %509  ;;  %v369_v47 = vadd.f32 %v368_v34, %v367_v20  ;;  %v329_v13 = vand.u32 127, %v232_v1 }
  0xc2   : > { %v439_v10 = vadd.f32 %v438_v55, %v437_v56  ;;  %v511_v14 = vrot.slane %v510_v4, 4  ;;  %v412_v29 = vadd.f32 %v411_v15, %v410_v63  ;;  %v484_v30 = vrot.slane %v483_v17, 2 }
  0xc3   : > { %v457_v56 = vrot.slane %v456_v44, 1  ;;  %vm330_vm14 = vcmp.eq.s32.totalorder %v329_v13, 0  ;;  %vm344_vm15 = vcmp.eq.s32.totalorder %v329_v13, 1  ;;  %vm357_vm0 = vcmp.eq.s32.totalorder %v329_v13, 2 }
  0xc4   : > { %v440_v21 = vrot.slane %v439_v10, 2  ;;  %v512_v25 = vadd.f32 %v511_v14, %v510_v4  ;;  %v413_v46 = vrot.slane %v412_v29, 1  ;;  %v485_v48 = vadd.f32 %v484_v30, %v483_v17 }
  0xc5   : > { %v458_v5 = vadd.f32 %v457_v56, %v456_v44  ;;  %vm375_vm1 = vcmp.eq.s32.totalorder %v329_v13, 8  ;;  %vm388_vm2 = vcmp.eq.s32.totalorder %v329_v13, 16  ;;  %vm420_vm3 = vcmp.eq.s32.totalorder %v329_v13, 9 }
  0xc6   : > { %v441_v41 = vadd.f32 %v440_v21, %v439_v10  ;;  %v513_v42 = vrot.slane %v512_v25, 2  ;;  %v414_v58 = vadd.f32 %v413_v46, %v412_v29  ;;  %v486_v55 = vrot.slane %v485_v48, 1 }
  0xc7   : > { %vm433_vm4 = vcmp.eq.s32.totalorder %v329_v13, 17  ;;  %vm449_vm5 = vcmp.eq.s32.totalorder %v329_v13, 10  ;;  %vm462_vm6 = vcmp.eq.s32.totalorder %v329_v13, 18  ;;  %vm478_vm7 = vcmp.eq.s32.totalorder %v329_v13, 11 }
  0xc8   : > { %v442_v51 = vrot.slane %v441_v41, 1  ;;  %v514_v53 = vadd.f32 %v513_v42, %v512_v25  ;;  %v487_v9 = vadd.f32 %v486_v55, %v485_v48  ;;  %vm491_vm8 = vcmp.eq.s32.totalorder %v329_v13, 19 }
  0xc9   : > { %vm507_vm9 = vcmp.eq.s32.totalorder %v329_v13, 12  ;;  %vm520_vm10 = vcmp.eq.s32.totalorder %v329_v13, 20 }
  0xca   : > { %v443_v62 = vadd.f32 %v442_v51, %v441_v41  ;;  %v515_v6 = vrot.slane %v514_v53, 1 }
  0xdd   : > { %v334_v8 = vpop.xlane.xlu0 %333 }
  0xde   : > { %v335_v11 = vrot.slane %v334_v8, 4 }
  0xe0   : > { %v336_v3 = vadd.f32 %v335_v11, %v334_v8  ;;  %v516_v11 = vadd.f32 %v515_v6, %v514_v53 }
  0xe1   : > { %v466_v18 = vpop.xlane.xlu0 %465 }
  0xe2   : > { %v337_v22 = vrot.slane %v336_v3, 2  ;;  %v467_v23 = vrot.slane %v466_v18, 4 }
  0xe4   : > { %v468_v27 = vadd.f32 %v467_v23, %v466_v18  ;;  %v338_v28 = vadd.f32 %v337_v22, %v336_v3 }
  0xe5   : > { %v495_v31 = vpop.xlane.xlu0 %494 }
  0xe6   : > { %v469_v35 = vrot.slane %v468_v27, 2  ;;  %v496_v36 = vrot.slane %v495_v31, 4  ;;  %v339_v40 = vrot.slane %v338_v28, 1 }
  0xe8   : > { %v497_v37 = vadd.f32 %v496_v36, %v495_v31  ;;  %v340_v45 = vadd.f32 %v339_v40, %v338_v28  ;;  %v470_v32 = vadd.f32 %v469_v35, %v468_v27 }
  0xe9   : > { %v524_v39 = vpop.xlane.xlu0 %523 }
  0xea   : > { %v498_v49 = vrot.slane %v497_v37, 2  ;;  %v525_v50 = vrot.slane %v524_v39, 4  ;;  %633 = vpush %v340_v45  ;;  %v471_v52 = vrot.slane %v470_v32, 1 }
  0xeb   : > { %635 = vpush %v353_v38 }
  0xec   : > { %v526_v57 = vadd.f32 %v525_v50, %v524_v39  ;;  %637 = vpush %v369_v47  ;;  %v499_v59 = vadd.f32 %v498_v49, %v497_v37  ;;  %v472_v63 = vadd.f32 %v471_v52, %v470_v32 }
  0xed   : > { %639 = vpush %v384_v54 }
  0xee   : > { %v527_v61 = vrot.slane %v526_v57, 2  ;;  %641 = vpush %v414_v58  ;;  %v500_v4 = vrot.slane %v499_v59, 1 }
  0xef   : > { %643 = vpush %v429_v60 }
  0xf0   : > { %v528_v7 = vadd.f32 %v527_v61, %v526_v57  ;;  %645 = vpush %v443_v62  ;;  %v501_v8 = vadd.f32 %v500_v4, %v499_v59 }
  0xf1   : > { %647 = vpush %v458_v5 }
  0xf2   : > { %649 = vpush %v472_v63  ;;  %v529_v10 = vrot.slane %v528_v7, 1 }
  0xf3   : > { %651 = vpush %v487_v9 }
  0xf4   : > { %653 = vpush %v501_v8  ;;  %v530_v12 = vadd.f32 %v529_v10, %v528_v7 }
  0xf5   : > { %655 = vpush %v516_v11 }
  0xf6   : > { %657 = vpush %v530_v12 }
 0x11b   : > { %s634_s20 = spop %633 }
 0x11c   : > { %v342_v14 = vstv %s634_s20  ;;  %s636_s21 = spop %635 }
 0x11d   : > { %v343_v15 = vsel %vm330_vm14, %v342_v14, 0.0  ;;  %v355_v3 = vstv %s636_s21  ;;  %s638_s22 = spop %637 }
 0x11e   : > { %v356_v16 = vsel %vm344_vm15, %v355_v3, %v343_v15  ;;  %v371_v17 = vstv %s638_s22  ;;  %s640_s23 = spop %639 }
 0x11f   : > { %v372_v18 = vsel %vm357_vm0, %v371_v17, %v356_v16  ;;  %v386_v19 = vstv %s640_s23  ;;  %s642_s24 = spop %641 }
 0x120   : > { %v387_v20 = vsel %vm375_vm1, %v386_v19, %v372_v18  ;;  %v416_v1 = vstv %s642_s24  ;;  %s644_s25 = spop %643 }
 0x121   : > { %v417_v21 = vsel %vm388_vm2, %v416_v1, %v387_v20  ;;  %v431_v22 = vstv %s644_s25  ;;  %s646_s26 = spop %645 }
 0x122   : > { %v432_v23 = vsel %vm420_vm3, %v431_v22, %v417_v21  ;;  %v445_v24 = vstv %s646_s26  ;;  %s648_s27 = spop %647 }
 0x123   : > { %v446_v25 = vsel %vm433_vm4, %v445_v24, %v432_v23  ;;  %v460_v26 = vstv %s648_s27  ;;  %s650_s28 = spop %649 }
 0x124   : > { %v461_v27 = vsel %vm449_vm5, %v460_v26, %v446_v25  ;;  %v474_v28 = vstv %s650_s28  ;;  %s652_s29 = spop %651 }
 0x125   : > { %v475_v29 = vsel %vm462_vm6, %v474_v28, %v461_v27  ;;  %v489_v30 = vstv %s652_s29  ;;  %s654_s30 = spop %653 }
 0x126   : > { %v490_v31 = vsel %vm478_vm7, %v489_v30, %v475_v29  ;;  %v503_v33 = vstv %s654_s30  ;;  %s656_s3 = spop %655 }
 0x127   : > { %v504_v34 = vsel %vm491_vm8, %v503_v33, %v490_v31  ;;  %v518_v2 = vstv %s656_s3  ;;  %s658_s7 = spop %657 }
 0x128   : > { %v519_v35 = vsel %vm507_vm9, %v518_v2, %v504_v34  ;;  %v532_v36 = vstv %s658_s7 }
 0x129   : > { %v533_v40 = vsel %vm520_vm10, %v532_v36, %v519_v35 }
 0x12a   : > { %546 = vst [vmem:[%s178_s6] sm:$0xff] %v533_v40 }
 0x12b PF: > { %s12_s11 = sadd.s32 1, %s721_s11   ;;  %s904_s9 = smov %s717_s10 }
 0x12c   : > { %p9_p5 = scmp.ge.s32.totalorder %s12_s11, 4   ;;  %s905_s10 = smov %s907_s12 }
 0x12e   :  { %11 = sbr.rel (!%p9_p5) target bundleno = 2 (0x2), region = 69 }

</bundles_post_ra>
